<compile_context>
chip_gen: v5e
topology: v5e:2x2
jax: 0.10.0
libtpu: 0.0.40
codegen_flags: <defaults>
</compile_context>

<pallas_src>
import numpy as np
import jax
import jax.numpy as jnp
from jax import lax
from jax.experimental import pallas as pl
from jax.experimental.pallas import tpu as pltpu


def _resblock_kernel(x_ref, w1_ref, w2_ref, s1_ref, b1_ref, s2_ref, b2_ref,
                     out_ref, xpad_s, hpad_s):
    """Fully fused ResBlock for one batch element (one grid step).

    x_ref  : (1, H, W*Cin)        f32   lane-dense input rows (also the residual)
    w1_ref : (3, W*Cin,  W*Cout)  bf16  conv1 band weights (dx taps + W padding folded in)
    w2_ref : (3, W*Cout, W*Cout)  bf16  conv2 band weights
    s*/b*  : (1, W*Cout)          f32   folded BN scale / bias, tiled per output column
    out_ref: (1, H, W*Cout)       f32
    xpad_s : (H+2, W*Cin)         f32   VMEM scratch; rows 0 and H+1 stay zero (H padding)
    hpad_s : (H+2, W*Cout)        f32   VMEM scratch for the intermediate activation h
    """
    H = x_ref.shape[1]

    x = x_ref[0]                                    # (H, W*Cin) f32

    # In-kernel zero padding along H.  Re-zeroed every grid step so the halo rows are
    # guaranteed zero on every core / iteration (scratch persists across grid steps).
    xpad_s[...] = jnp.zeros_like(xpad_s)
    xpad_s[1:H + 1, :] = x

    def conv3x3(pad_ref, w_ref):
        # 3 lane-dense MXU matmuls, one per dy row tap.  Leading-dim row slices are free;
        # the dx taps and the width zero-padding live inside the band weight matrices.
        acc = jnp.dot(pad_ref[0:H, :].astype(jnp.bfloat16), w_ref[0],
                      preferred_element_type=jnp.float32)
        acc += jnp.dot(pad_ref[1:H + 1, :].astype(jnp.bfloat16), w_ref[1],
                       preferred_element_type=jnp.float32)
        acc += jnp.dot(pad_ref[2:H + 2, :].astype(jnp.bfloat16), w_ref[2],
                       preferred_element_type=jnp.float32)
        return acc                                   # (H, W*Cout) f32

    # conv1 + bn1 + relu ; h never leaves VMEM.
    h = jnp.maximum(conv3x3(xpad_s, w1_ref) * s1_ref[...] + b1_ref[...], 0.0)

    hpad_s[...] = jnp.zeros_like(hpad_s)
    hpad_s[1:H + 1, :] = h

    # conv2 + bn2 + identity residual (f32) + relu ; full-width unmasked store.
    y = conv3x3(hpad_s, w2_ref) * s2_ref[...] + b2_ref[...] + x
    out_ref[0] = jnp.maximum(y, 0.0).astype(out_ref.dtype)


def _band_weights(w_hwio, W):
    """Fold the dx taps and the width zero-padding of a 3x3 conv into 3 block-tridiagonal
    (W*Cin, W*Cout) matrices (one per dy), so the conv becomes 3 lane-dense matmuls acting
    on (H, W*Cin) row slabs.  jit-safe glue; in a real model build these once."""
    _, _, Cin, Cout = w_hwio.shape
    # S[dx, jp, j] = 1 iff input column jp feeds output column j through horizontal tap dx.
    S = np.zeros((3, W, W), np.float32)
    for dx in range(3):
        for j in range(W):
            jp = j + dx - 1
            if 0 <= jp < W:
                S[dx, jp, j] = 1.0
    band = jnp.einsum("yxio,xpj->ypijo", w_hwio.astype(jnp.float32), jnp.asarray(S))
    return band.reshape(3, W * Cin, W * Cout).astype(jnp.bfloat16)


def _fold_bn(gamma, beta, mean, var, eps=1e-5):
    scale = gamma / jnp.sqrt(var + eps)
    return scale, beta - mean * scale


def resblock_forward(x_nchw, params):
    """ResBlock forward (stride=1, downsample=None). x_nchw: (N,C,H,W) f32 -> (N,C,H,W)."""
    N, Cin, H, W = x_nchw.shape
    Cout = params["w1"].shape[-1]
    assert Cin == Cout, "stride=1 / downsample=None requires inplanes == planes"

    # NCHW -> lane-dense (N, H, W*C) rows (glue; a real pipeline would stay NHWC throughout).
    x2d = jnp.transpose(x_nchw, (0, 2, 3, 1)).reshape(N, H, W * Cin)

    s1, b1 = _fold_bn(params["bn1_gamma"], params["bn1_beta"],
                      params["bn1_mean"], params["bn1_var"])
    s2, b2 = _fold_bn(params["bn2_gamma"], params["bn2_beta"],
                      params["bn2_mean"], params["bn2_var"])

    w1b = _band_weights(params["w1"], W)                      # (3, W*Cin,  W*Cout) bf16
    w2b = _band_weights(params["w2"], W)                      # (3, W*Cout, W*Cout) bf16
    s1r = jnp.tile(s1, W).reshape(1, W * Cout).astype(jnp.float32)
    b1r = jnp.tile(b1, W).reshape(1, W * Cout).astype(jnp.float32)
    s2r = jnp.tile(s2, W).reshape(1, W * Cout).astype(jnp.float32)
    b2r = jnp.tile(b2, W).reshape(1, W * Cout).astype(jnp.float32)

    out2d = pl.pallas_call(
        _resblock_kernel,
        out_shape=jax.ShapeDtypeStruct((N, H, W * Cout), jnp.float32),
        grid_spec=pltpu.PrefetchScalarGridSpec(
            num_scalar_prefetch=0,
            grid=(N,),
            in_specs=[
                pl.BlockSpec((1, H, W * Cin), lambda n: (n, 0, 0)),
                pl.BlockSpec((3, W * Cin, W * Cout), lambda n: (0, 0, 0)),
                pl.BlockSpec((3, W * Cout, W * Cout), lambda n: (0, 0, 0)),
                pl.BlockSpec((1, W * Cout), lambda n: (0, 0)),
                pl.BlockSpec((1, W * Cout), lambda n: (0, 0)),
                pl.BlockSpec((1, W * Cout), lambda n: (0, 0)),
                pl.BlockSpec((1, W * Cout), lambda n: (0, 0)),
            ],
            out_specs=pl.BlockSpec((1, H, W * Cout), lambda n: (n, 0, 0)),
            scratch_shapes=[
                pltpu.VMEM((H + 2, W * Cin), jnp.float32),
                pltpu.VMEM((H + 2, W * Cout), jnp.float32),
            ],
        ),
        compiler_params=pltpu.CompilerParams(
            dimension_semantics=("parallel",)),
    )(x2d, w1b, w2b, s1r, b1r, s2r, b2r)

    out = out2d.reshape(N, H, W, Cout)
    return jnp.transpose(out, (0, 3, 1, 2))                   # -> NCHW


def _reference_forward(x_nchw, params):
    """Pure-JAX f32 reference (lax.conv) matching the PyTorch module (eval-mode BN)."""
    def conv(x, w_hwio):
        w_oihw = jnp.transpose(w_hwio, (3, 2, 0, 1))
        return lax.conv_general_dilated(
            x, w_oihw, window_strides=(1, 1), padding=((1, 1), (1, 1)),
            dimension_numbers=("NCHW", "OIHW", "NCHW"))

    def bn(x, g, b, m, v, eps=1e-5):
        inv = g / jnp.sqrt(v + eps)
        return x * inv[None, :, None, None] + (b - m * inv)[None, :, None, None]

    h = jax.nn.relu(bn(conv(x_nchw, params["w1"]), params["bn1_gamma"],
                       params["bn1_beta"], params["bn1_mean"], params["bn1_var"]))
    y = bn(conv(h, params["w2"]), params["bn2_gamma"],
           params["bn2_beta"], params["bn2_mean"], params["bn2_var"])
    return jax.nn.relu(y + x_nchw)


def make_params(key, inplanes, planes):
    ks = jax.random.split(key, 6)
    # conv weights in HWIO layout: (3, 3, Cin, Cout)
    w1 = jax.random.normal(ks[0], (3, 3, inplanes, planes), jnp.float32) * 0.1
    w2 = jax.random.normal(ks[1], (3, 3, planes, planes), jnp.float32) * 0.1
    return {
        "w1": w1,
        "w2": w2,
        "bn1_gamma": 1.0 + 0.1 * jax.random.normal(ks[2], (planes,), jnp.float32),
        "bn1_beta": 0.1 * jax.random.normal(ks[3], (planes,), jnp.float32),
        "bn1_mean": 0.05 * jnp.arange(planes, dtype=jnp.float32),
        "bn1_var": 1.0 + 0.01 * jnp.arange(planes, dtype=jnp.float32),
        "bn2_gamma": 1.0 + 0.1 * jax.random.normal(ks[4], (planes,), jnp.float32),
        "bn2_beta": 0.1 * jax.random.normal(ks[5], (planes,), jnp.float32),
        "bn2_mean": -0.03 * jnp.arange(planes, dtype=jnp.float32),
        "bn2_var": 1.0 + 0.02 * jnp.arange(planes, dtype=jnp.float32),
    }


if __name__ == "__main__":
    N, C, H, W = 2, 8, 16, 16          # W*C = 128 -> fully lane-dense tiles
    key = jax.random.PRNGKey(0)
    kx, kp = jax.random.split(key)
    x = jax.random.normal(kx, (N, C, H, W), jnp.float32)
    params = make_params(kp, C, C)

    out = jax.block_until_ready(jax.jit(resblock_forward)(x, params))
    ref = jax.block_until_ready(_reference_forward(x, params))

    # bf16 MXU operands with f32 accumulation -> relaxed tolerance vs. the f32 reference.
    np.testing.assert_allclose(np.asarray(out), np.asarray(ref), rtol=5e-2, atol=5e-2)

    print("KERNEL_OK")
</pallas_src>

<mosaic_0001>
module attributes {stable_mosaic.version = 11 : i64} {
  func.func @_resblock_kernel(%arg0: i32, %arg1: memref<1x16x128xf32, #tpu.memory_space<vmem>>, %arg2: memref<3x128x128xbf16, #tpu.memory_space<vmem>>, %arg3: memref<3x128x128xbf16, #tpu.memory_space<vmem>>, %arg4: memref<1x128xf32, #tpu.memory_space<vmem>>, %arg5: memref<1x128xf32, #tpu.memory_space<vmem>>, %arg6: memref<1x128xf32, #tpu.memory_space<vmem>>, %arg7: memref<1x128xf32, #tpu.memory_space<vmem>>, %arg8: memref<1x16x128xf32, #tpu.memory_space<vmem>>, %arg9: memref<18x128xf32, #tpu.memory_space<vmem>>, %arg10: memref<18x128xf32, #tpu.memory_space<vmem>>) attributes {dimension_semantics = [#tpu.dimension_semantics<parallel>], iteration_bounds = array<i64: 2>, scalar_prefetch = 0 : i64, scratch_operands = 2 : i64, tpu.core_type = #tpu.core_type<tc>, window_params = [{transform_indices = @transform_0, window_bounds = array<i64: 1, 16, 128>}, {pipeline_mode = #tpu.pipeline_mode<synchronous>, transform_indices = @transform_1, window_bounds = array<i64: 3, 128, 128>}, {pipeline_mode = #tpu.pipeline_mode<synchronous>, transform_indices = @transform_2, window_bounds = array<i64: 3, 128, 128>}, {pipeline_mode = #tpu.pipeline_mode<synchronous>, transform_indices = @transform_3, window_bounds = array<i64: 1, 128>}, {pipeline_mode = #tpu.pipeline_mode<synchronous>, transform_indices = @transform_4, window_bounds = array<i64: 1, 128>}, {pipeline_mode = #tpu.pipeline_mode<synchronous>, transform_indices = @transform_5, window_bounds = array<i64: 1, 128>}, {pipeline_mode = #tpu.pipeline_mode<synchronous>, transform_indices = @transform_6, window_bounds = array<i64: 1, 128>}, {transform_indices = @transform_7, window_bounds = array<i64: 1, 16, 128>}]} {
    %c0 = arith.constant 0 : index
    %c0_0 = arith.constant 0 : index
    %c0_1 = arith.constant 0 : index
    %0 = vector.load %arg1[%c0, %c0_0, %c0_1] : memref<1x16x128xf32, #tpu.memory_space<vmem>>, vector<1x16x128xf32>
    %1 = vector.shape_cast %0 : vector<1x16x128xf32> to vector<16x128xf32>
    %cst = arith.constant 0.000000e+00 : f32
    %2 = vector.broadcast %cst : f32 to vector<18x128xf32>
    %c0_2 = arith.constant 0 : index
    %c0_3 = arith.constant 0 : index
    %3 = vector.load %arg9[%c0_2, %c0_3] : memref<18x128xf32, #tpu.memory_space<vmem>>, vector<18x128xf32>
    tpu.vector_store %arg9[%c0_2, %c0_3], %2 {strides = array<i32>} : memref<18x128xf32, #tpu.memory_space<vmem>>, vector<18x128xf32>,
    %c1 = arith.constant 1 : index
    %c0_4 = arith.constant 0 : index
    %4 = vector.load %arg9[%c1, %c0_4] : memref<18x128xf32, #tpu.memory_space<vmem>>, vector<16x128xf32>
    tpu.vector_store %arg9[%c1, %c0_4], %1 {strides = array<i32>} : memref<18x128xf32, #tpu.memory_space<vmem>>, vector<16x128xf32>,
    %c0_5 = arith.constant 0 : index
    %c0_6 = arith.constant 0 : index
    %5 = vector.load %arg9[%c0_5, %c0_6] : memref<18x128xf32, #tpu.memory_space<vmem>>, vector<16x128xf32>
    %6 = arith.truncf %5 : vector<16x128xf32> to vector<16x128xbf16>
    %c0_7 = arith.constant 0 : index
    %c0_8 = arith.constant 0 : index
    %c0_9 = arith.constant 0 : index
    %7 = vector.load %arg2[%c0_7, %c0_8, %c0_9] : memref<3x128x128xbf16, #tpu.memory_space<vmem>>, vector<1x128x128xbf16>
    %8 = vector.shape_cast %7 : vector<1x128x128xbf16> to vector<128x128xbf16>
    %cst_10 = arith.constant dense<0.000000e+00> : vector<16x128xf32>
    %9 = tpu.matmul %6, %8, %cst_10 {dimension_numbers = #tpu.dot_dimension_numbers<[1], [0], [0], [1], [0, 0, 1, 1], [], []>} : vector<16x128xbf16>, vector<128x128xbf16>, vector<16x128xf32> -> vector<16x128xf32>
    %c1_11 = arith.constant 1 : index
    %c0_12 = arith.constant 0 : index
    %10 = vector.load %arg9[%c1_11, %c0_12] : memref<18x128xf32, #tpu.memory_space<vmem>>, vector<16x128xf32>
    %11 = arith.truncf %10 : vector<16x128xf32> to vector<16x128xbf16>
    %c1_13 = arith.constant 1 : index
    %c0_14 = arith.constant 0 : index
    %c0_15 = arith.constant 0 : index
    %12 = vector.load %arg2[%c1_13, %c0_14, %c0_15] : memref<3x128x128xbf16, #tpu.memory_space<vmem>>, vector<1x128x128xbf16>
    %13 = vector.shape_cast %12 : vector<1x128x128xbf16> to vector<128x128xbf16>
    %cst_16 = arith.constant dense<0.000000e+00> : vector<16x128xf32>
    %14 = tpu.matmul %11, %13, %cst_16 {dimension_numbers = #tpu.dot_dimension_numbers<[1], [0], [0], [1], [0, 0, 1, 1], [], []>} : vector<16x128xbf16>, vector<128x128xbf16>, vector<16x128xf32> -> vector<16x128xf32>
    %15 = arith.addf %9, %14 : vector<16x128xf32>
    %c2 = arith.constant 2 : index
    %c0_17 = arith.constant 0 : index
    %16 = vector.load %arg9[%c2, %c0_17] : memref<18x128xf32, #tpu.memory_space<vmem>>, vector<16x128xf32>
    %17 = arith.truncf %16 : vector<16x128xf32> to vector<16x128xbf16>
    %c2_18 = arith.constant 2 : index
    %c0_19 = arith.constant 0 : index
    %c0_20 = arith.constant 0 : index
    %18 = vector.load %arg2[%c2_18, %c0_19, %c0_20] : memref<3x128x128xbf16, #tpu.memory_space<vmem>>, vector<1x128x128xbf16>
    %19 = vector.shape_cast %18 : vector<1x128x128xbf16> to vector<128x128xbf16>
    %cst_21 = arith.constant dense<0.000000e+00> : vector<16x128xf32>
    %20 = tpu.matmul %17, %19, %cst_21 {dimension_numbers = #tpu.dot_dimension_numbers<[1], [0], [0], [1], [0, 0, 1, 1], [], []>} : vector<16x128xbf16>, vector<128x128xbf16>, vector<16x128xf32> -> vector<16x128xf32>
    %21 = arith.addf %15, %20 : vector<16x128xf32>
    %c0_22 = arith.constant 0 : index
    %c0_23 = arith.constant 0 : index
    %22 = vector.load %arg4[%c0_22, %c0_23] : memref<1x128xf32, #tpu.memory_space<vmem>>, vector<1x128xf32>
    %23 = vector.broadcast %22 : vector<1x128xf32> to vector<16x128xf32>
    %24 = arith.mulf %21, %23 : vector<16x128xf32>
    %c0_24 = arith.constant 0 : index
    %c0_25 = arith.constant 0 : index
    %25 = vector.load %arg5[%c0_24, %c0_25] : memref<1x128xf32, #tpu.memory_space<vmem>>, vector<1x128xf32>
    %26 = vector.broadcast %25 : vector<1x128xf32> to vector<16x128xf32>
    %27 = arith.addf %24, %26 : vector<16x128xf32>
    %cst_26 = arith.constant 0.000000e+00 : f32
    %28 = vector.broadcast %cst_26 : f32 to vector<16x128xf32>
    %29 = arith.maximumf %27, %28 : vector<16x128xf32>
    %cst_27 = arith.constant 0.000000e+00 : f32
    %30 = vector.broadcast %cst_27 : f32 to vector<18x128xf32>
    %c0_28 = arith.constant 0 : index
    %c0_29 = arith.constant 0 : index
    %31 = vector.load %arg10[%c0_28, %c0_29] : memref<18x128xf32, #tpu.memory_space<vmem>>, vector<18x128xf32>
    tpu.vector_store %arg10[%c0_28, %c0_29], %30 {strides = array<i32>} : memref<18x128xf32, #tpu.memory_space<vmem>>, vector<18x128xf32>,
    %c1_30 = arith.constant 1 : index
    %c0_31 = arith.constant 0 : index
    %32 = vector.load %arg10[%c1_30, %c0_31] : memref<18x128xf32, #tpu.memory_space<vmem>>, vector<16x128xf32>
    tpu.vector_store %arg10[%c1_30, %c0_31], %29 {strides = array<i32>} : memref<18x128xf32, #tpu.memory_space<vmem>>, vector<16x128xf32>,
    %c0_32 = arith.constant 0 : index
    %c0_33 = arith.constant 0 : index
    %33 = vector.load %arg10[%c0_32, %c0_33] : memref<18x128xf32, #tpu.memory_space<vmem>>, vector<16x128xf32>
    %34 = arith.truncf %33 : vector<16x128xf32> to vector<16x128xbf16>
    %c0_34 = arith.constant 0 : index
    %c0_35 = arith.constant 0 : index
    %c0_36 = arith.constant 0 : index
    %35 = vector.load %arg3[%c0_34, %c0_35, %c0_36] : memref<3x128x128xbf16, #tpu.memory_space<vmem>>, vector<1x128x128xbf16>
    %36 = vector.shape_cast %35 : vector<1x128x128xbf16> to vector<128x128xbf16>
    %cst_37 = arith.constant dense<0.000000e+00> : vector<16x128xf32>
    %37 = tpu.matmul %34, %36, %cst_37 {dimension_numbers = #tpu.dot_dimension_numbers<[1], [0], [0], [1], [0, 0, 1, 1], [], []>} : vector<16x128xbf16>, vector<128x128xbf16>, vector<16x128xf32> -> vector<16x128xf32>
    %c1_38 = arith.constant 1 : index
    %c0_39 = arith.constant 0 : index
    %38 = vector.load %arg10[%c1_38, %c0_39] : memref<18x128xf32, #tpu.memory_space<vmem>>, vector<16x128xf32>
    %39 = arith.truncf %38 : vector<16x128xf32> to vector<16x128xbf16>
    %c1_40 = arith.constant 1 : index
    %c0_41 = arith.constant 0 : index
    %c0_42 = arith.constant 0 : index
    %40 = vector.load %arg3[%c1_40, %c0_41, %c0_42] : memref<3x128x128xbf16, #tpu.memory_space<vmem>>, vector<1x128x128xbf16>
    %41 = vector.shape_cast %40 : vector<1x128x128xbf16> to vector<128x128xbf16>
    %cst_43 = arith.constant dense<0.000000e+00> : vector<16x128xf32>
    %42 = tpu.matmul %39, %41, %cst_43 {dimension_numbers = #tpu.dot_dimension_numbers<[1], [0], [0], [1], [0, 0, 1, 1], [], []>} : vector<16x128xbf16>, vector<128x128xbf16>, vector<16x128xf32> -> vector<16x128xf32>
    %43 = arith.addf %37, %42 : vector<16x128xf32>
    %c2_44 = arith.constant 2 : index
    %c0_45 = arith.constant 0 : index
    %44 = vector.load %arg10[%c2_44, %c0_45] : memref<18x128xf32, #tpu.memory_space<vmem>>, vector<16x128xf32>
    %45 = arith.truncf %44 : vector<16x128xf32> to vector<16x128xbf16>
    %c2_46 = arith.constant 2 : index
    %c0_47 = arith.constant 0 : index
    %c0_48 = arith.constant 0 : index
    %46 = vector.load %arg3[%c2_46, %c0_47, %c0_48] : memref<3x128x128xbf16, #tpu.memory_space<vmem>>, vector<1x128x128xbf16>
    %47 = vector.shape_cast %46 : vector<1x128x128xbf16> to vector<128x128xbf16>
    %cst_49 = arith.constant dense<0.000000e+00> : vector<16x128xf32>
    %48 = tpu.matmul %45, %47, %cst_49 {dimension_numbers = #tpu.dot_dimension_numbers<[1], [0], [0], [1], [0, 0, 1, 1], [], []>} : vector<16x128xbf16>, vector<128x128xbf16>, vector<16x128xf32> -> vector<16x128xf32>
    %49 = arith.addf %43, %48 : vector<16x128xf32>
    %c0_50 = arith.constant 0 : index
    %c0_51 = arith.constant 0 : index
    %50 = vector.load %arg6[%c0_50, %c0_51] : memref<1x128xf32, #tpu.memory_space<vmem>>, vector<1x128xf32>
    %51 = vector.broadcast %50 : vector<1x128xf32> to vector<16x128xf32>
    %52 = arith.mulf %49, %51 : vector<16x128xf32>
    %c0_52 = arith.constant 0 : index
    %c0_53 = arith.constant 0 : index
    %53 = vector.load %arg7[%c0_52, %c0_53] : memref<1x128xf32, #tpu.memory_space<vmem>>, vector<1x128xf32>
    %54 = vector.broadcast %53 : vector<1x128xf32> to vector<16x128xf32>
    %55 = arith.addf %52, %54 : vector<16x128xf32>
    %56 = arith.addf %55, %1 : vector<16x128xf32>
    %cst_54 = arith.constant 0.000000e+00 : f32
    %57 = vector.broadcast %cst_54 : f32 to vector<16x128xf32>
    %58 = arith.maximumf %56, %57 : vector<16x128xf32>
    %c0_55 = arith.constant 0 : index
    %c0_56 = arith.constant 0 : index
    %c0_57 = arith.constant 0 : index
    %59 = vector.load %arg8[%c0_55, %c0_56, %c0_57] : memref<1x16x128xf32, #tpu.memory_space<vmem>>, vector<1x16x128xf32>
    %60 = vector.shape_cast %59 : vector<1x16x128xf32> to vector<16x128xf32>
    %61 = vector.shape_cast %58 : vector<16x128xf32> to vector<1x16x128xf32>
    tpu.vector_store %arg8[%c0_55, %c0_56, %c0_57], %61 {strides = array<i32>} : memref<1x16x128xf32, #tpu.memory_space<vmem>>, vector<1x16x128xf32>,
    return
  }
  func.func @transform_0(%arg0: i32) -> (i32, i32, i32) {
    %c0_i32 = arith.constant 0 : i32
    %c0_i32_0 = arith.constant 0 : i32
    %c0_i32_1 = arith.constant 0 : i32
    return %arg0, %c0_i32, %c0_i32_0 : i32, i32, i32
  }
  func.func @transform_1(%arg0: i32) -> (i32, i32, i32) {
    %c0_i32 = arith.constant 0 : i32
    %c0_i32_0 = arith.constant 0 : i32
    %c0_i32_1 = arith.constant 0 : i32
    %c0_i32_2 = arith.constant 0 : i32
    return %c0_i32, %c0_i32_0, %c0_i32_1 : i32, i32, i32
  }
  func.func @transform_2(%arg0: i32) -> (i32, i32, i32) {
    %c0_i32 = arith.constant 0 : i32
    %c0_i32_0 = arith.constant 0 : i32
    %c0_i32_1 = arith.constant 0 : i32
    %c0_i32_2 = arith.constant 0 : i32
    return %c0_i32, %c0_i32_0, %c0_i32_1 : i32, i32, i32
  }
  func.func @transform_3(%arg0: i32) -> (i32, i32) {
    %c0_i32 = arith.constant 0 : i32
    %c0_i32_0 = arith.constant 0 : i32
    %c0_i32_1 = arith.constant 0 : i32
    return %c0_i32, %c0_i32_0 : i32, i32
  }
  func.func @transform_4(%arg0: i32) -> (i32, i32) {
    %c0_i32 = arith.constant 0 : i32
    %c0_i32_0 = arith.constant 0 : i32
    %c0_i32_1 = arith.constant 0 : i32
    return %c0_i32, %c0_i32_0 : i32, i32
  }
  func.func @transform_5(%arg0: i32) -> (i32, i32) {
    %c0_i32 = arith.constant 0 : i32
    %c0_i32_0 = arith.constant 0 : i32
    %c0_i32_1 = arith.constant 0 : i32
    return %c0_i32, %c0_i32_0 : i32, i32
  }
  func.func @transform_6(%arg0: i32) -> (i32, i32) {
    %c0_i32 = arith.constant 0 : i32
    %c0_i32_0 = arith.constant 0 : i32
    %c0_i32_1 = arith.constant 0 : i32
    return %c0_i32, %c0_i32_0 : i32, i32
  }
  func.func @transform_7(%arg0: i32) -> (i32, i32, i32) {
    %c0_i32 = arith.constant 0 : i32
    %c0_i32_0 = arith.constant 0 : i32
    %c0_i32_1 = arith.constant 0 : i32
    return %arg0, %c0_i32, %c0_i32_0 : i32, i32, i32
  }
}

</mosaic_0001>

<bundles_post_ra>
// kernel: tile.23
= control target key start
LH: loop header
LB: loop body
LE: loop exit
PB: predicated region body
PF: predicated region fallthrough
CT: control target
= control target key end

     0   :  { %s28_s0 = inlined_call_operand.vmem [shape: f32[8], index: 0, kind: input, shape index: {}]   ;;  %s29_s1 = inlined_call_operand.vmem [shape: f32[16,8], index: 1, kind: output, shape index: {}]  }
   0x1   :  { %v4_v0 = vld [vmem:[%s28_s0] ss:$0 sm:$0xff] }
   0x2   :  { %5 = vst [vmem:[%s29_s1] sm:$0xff] %v4_v0 }
   0x3   :  { %8 = vst [vmem:[%s29_s1 + $0x8] sm:$0xff] %v4_v0 }

// kernel: tile.24
= control target key start
LH: loop header
LB: loop body
LE: loop exit
PB: predicated region body
PF: predicated region fallthrough
CT: control target
= control target key end

     0   :  { %s131_s10 = smov 120   ;;  %s132_s11 = smov 104   ;;  %vm3_vm0 = vcmask 64512   ;;  %vm9_vm1 = vcmask 1048512   ;;  %vm15_vm2 = vcmask 982912   ;;  %vm21_vm3 = vcmask 917312   ;;  %s207_s0 = inlined_call_operand.vmem [shape: f32[16,8], index: 0, kind: input, shape index: {}]   ;;  %s208_s1 = inlined_call_operand.vmem [shape: f32[1,128], index: 1, kind: output, shape index: {}]  }
   0x1   :  { %v101_v0 = vld [vmem:[%s207_s0 + $0xf] sm:$0x1]   ;;  %v103_v1 = vld [vmem:[%s207_s0 + $0xd] sm:$0x1]   ;;  %v105_v2 = vld [vmem:[%s207_s0 + $0xb] sm:$0x1]  }
   0x2   :  { %7 = vrot.lane.b32.xlu0 %v101_v0, %s131_s10  ;;  %19 = vrot.lane.b32.xlu1 %v103_v1, %s132_s11  ;;  %s133_s14 = smov 88   ;;  %v102_v3 = vld [vmem:[%s207_s0 + $0xe] sm:$0x1]   ;;  %v104_v4 = vld [vmem:[%s207_s0 + $0xc] sm:$0x1]   ;;  %s134_s19 = smov 112  }
   0x3   :  { %31 = vrot.lane.b32.xlu2 %v105_v2, %s133_s14  ;;  %s135_s20 = smov 96   ;;  %v106_v5 = vld [vmem:[%s207_s0 + $0xa] sm:$0x1]   ;;  %s136_s23 = smov 80   ;;  %v107_v6 = vld [vmem:[%s207_s0 + $0x9] sm:$0x1]  }
   0x4   :  { %v108_v7 = vld [vmem:[%s207_s0 + $0x8] sm:$0x1]   ;;  %s137_s28 = smov 72   ;;  %s138_s29 = smov 64   ;;  %v109_v8 = vld [vmem:[%s207_s0 + $0x7] sm:$0x1]  }
   0x5   :  { %s139_s3 = smov 56   ;;  %v110_v9 = vld [vmem:[%s207_s0 + $0x6] sm:$0x1]   ;;  %v111_v10 = vld [vmem:[%s207_s0 + $0x5] sm:$0x1]   ;;  %s140_s8 = smov 48  }
   0x6   :  { %s141_s9 = smov 40   ;;  %v112_v11 = vld [vmem:[%s207_s0 + $0x4] sm:$0x1]   ;;  %s142_s12 = smov 32   ;;  %v113_v12 = vld [vmem:[%s207_s0 + $0x3] sm:$0x1]  }
   0x7   :  { %v114_v13 = vld [vmem:[%s207_s0 + $0x2] sm:$0x1]   ;;  %s143_s17 = smov 24   ;;  %s144_s18 = smov 16   ;;  %v115_v14 = vld [vmem:[%s207_s0 + $0x1] sm:$0x1]  }
   0x8   :  { %s145_s21 = smov 8   ;;  %v2_v15 = vld [vmem:[%s207_s0] sm:$0x1]   ;;  %vm27_vm4 = vcmask 851712   ;;  %vm33_vm5 = vcmask 786112   ;;  %vm39_vm6 = vcmask 720512  }
   0x9   :  { %4 = vst.msk [vmem:[#allocation0] sm:$0x1] %vm3_vm0, %v2_v15   ;;  %vm45_vm7 = vcmask 654912   ;;  %vm51_vm8 = vcmask 589312   ;;  %vm57_vm9 = vcmask 523712   ;;  %vm63_vm10 = vcmask 458112  }
   0xa   :  { %13 = vrot.lane.b32.xlu0 %v102_v3, %s134_s19  ;;  %25 = vrot.lane.b32.xlu1 %v104_v4, %s135_s20  ;;  %vm69_vm11 = vcmask 392512   ;;  %vm75_vm12 = vcmask 326912   ;;  %vm81_vm13 = vcmask 261312   ;;  %vm87_vm14 = vcmask 195712  }
   0xb   :  { %37 = vrot.lane.b32.xlu2 %v106_v5, %s136_s23  ;;  %vm93_vm15 = vcmask 130112  }
  0x12   :  { %43 = vrot.lane.b32.xlu0 %v107_v6, %s137_s28  ;;  %49 = vrot.lane.b32.xlu1 %v108_v7, %s138_s29 }
  0x13   :  { %55 = vrot.lane.b32.xlu2 %v109_v8, %s139_s3 }
  0x1a   :  { %61 = vrot.lane.b32.xlu0 %v110_v9, %s140_s8  ;;  %67 = vrot.lane.b32.xlu1 %v111_v10, %s141_s9 }
  0x1b   :  { %73 = vrot.lane.b32.xlu2 %v112_v11, %s142_s12 }
  0x22   :  { %79 = vrot.lane.b32.xlu0 %v113_v12, %s143_s17  ;;  %85 = vrot.lane.b32.xlu1 %v114_v13, %s144_s18 }
  0x23   :  { %91 = vrot.lane.b32.xlu2 %v115_v14, %s145_s21 }
  0x5d   :  { %v32_v16 = vpop.permute.xlu2 %31  }
  0x65   :  { %v38_v17 = vpop.permute.xlu2 %37  }
  0x6d   :  { %v56_v18 = vpop.permute.xlu2 %55  }
  0x74   :  { %v8_v19 = vpop.permute.xlu0 %7   ;;  %v20_v20 = vpop.permute.xlu1 %19  }
  0x75   :  { %10 = vst.msk [vmem:[#allocation0] sm:$0x1] %vm9_vm1, %v8_v19   ;;  %v74_v21 = vpop.permute.xlu2 %73  }
  0x7c   :  { %v14_v22 = vpop.permute.xlu0 %13   ;;  %v26_v23 = vpop.permute.xlu1 %25  }
  0x7d   :  { %16 = vst.msk [vmem:[#allocation0] sm:$0x1] %vm15_vm2, %v14_v22   ;;  %v92_v24 = vpop.permute.xlu2 %91  }
  0x7e   :  { %22 = vst.msk [vmem:[#allocation0] sm:$0x1] %vm21_vm3, %v20_v20  }
  0x7f   :  { %28 = vst.msk [vmem:[#allocation0] sm:$0x1] %vm27_vm4, %v26_v23  }
  0x80   :  { %34 = vst.msk [vmem:[#allocation0] sm:$0x1] %vm33_vm5, %v32_v16  }
  0x81   :  { %40 = vst.msk [vmem:[#allocation0] sm:$0x1] %vm39_vm6, %v38_v17  }
  0x84   :  { %v44_v25 = vpop.permute.xlu0 %43   ;;  %v50_v26 = vpop.permute.xlu1 %49  }
  0x85   :  { %46 = vst.msk [vmem:[#allocation0] sm:$0x1] %vm45_vm7, %v44_v25  }
  0x86   :  { %52 = vst.msk [vmem:[#allocation0] sm:$0x1] %vm51_vm8, %v50_v26  }
  0x87   :  { %58 = vst.msk [vmem:[#allocation0] sm:$0x1] %vm57_vm9, %v56_v18  }
  0x8c   :  { %v62_v27 = vpop.permute.xlu0 %61   ;;  %v68_v28 = vpop.permute.xlu1 %67  }
  0x8d   :  { %64 = vst.msk [vmem:[#allocation0] sm:$0x1] %vm63_vm10, %v62_v27  }
  0x8e   :  { %70 = vst.msk [vmem:[#allocation0] sm:$0x1] %vm69_vm11, %v68_v28  }
  0x8f   :  { %76 = vst.msk [vmem:[#allocation0] sm:$0x1] %vm75_vm12, %v74_v21  }
  0x94   :  { %v80_v29 = vpop.permute.xlu0 %79   ;;  %v86_v30 = vpop.permute.xlu1 %85  }
  0x95   :  { %82 = vst.msk [vmem:[#allocation0] sm:$0x1] %vm81_vm13, %v80_v29  }
  0x96   :  { %88 = vst.msk [vmem:[#allocation0] sm:$0x1] %vm87_vm14, %v86_v30  }
  0x97   :  { %94 = vst.msk [vmem:[#allocation0] sm:$0x1] %vm93_vm15, %v92_v24  }
  0x9e   :  { %v97_v31 = vld [vmem:[#allocation0] sm:$0x1] }
  0x9f   :  { %100 = vst [vmem:[%s208_s1] sm:$0x1] %v97_v31 }

// kernel: resblock_forward.1
= control target key start
LH: loop header
LB: loop body
LE: loop exit
PB: predicated region body
PF: predicated region fallthrough
CT: control target
= control target key end

     0   :  { %s1251_s24 = smov 0   ;;  %s1441_s0 = inlined_call_operand.vmem [shape: f32[2,16,128], index: 0, kind: input, shape index: {}]   ;;  %s1442_s1 = inlined_call_operand.vmem [shape: bf16[3,128,128], index: 1, kind: input, shape index: {}]   ;;  %s1443_s2 = inlined_call_operand.vmem [shape: bf16[3,128,128], index: 2, kind: input, shape index: {}]   ;;  %s1444_s3 = inlined_call_operand.vmem [shape: f32[1,128], index: 3, kind: input, shape index: {}]   ;;  %s1445_s4 = inlined_call_operand.vmem [shape: f32[1,128], index: 4, kind: input, shape index: {}]   ;;  %s1446_s5 = inlined_call_operand.vmem [shape: f32[1,128], index: 5, kind: input, shape index: {}]   ;;  %s1447_s6 = inlined_call_operand.vmem [shape: f32[1,128], index: 6, kind: input, shape index: {}]   ;;  %s1448_s7 = inlined_call_operand.vmem [shape: f32[2,16,128], index: 7, kind: output, shape index: {}]  }
   0x1 LB: > { %s872_s25 = sadd.s32 4294967295, %s1208_s24   ;;  %p876_p0 = scmp.ge.s32.totalorder %s1208_s24, 1  ;;  %s1208_s24 = sphi %s1251_s24, %s17_s24  }
   0x2   : > { %p237_p1 = scmp.lt.s32.totalorder %s1208_s24, 3 }
   0x4   : > { %p238_p2 = pnand %p876_p0, %p237_p1 }
   0x5   : > { %p269_p3 = scmp.lt.s32.totalorder (!%p238_p2), %s872_s25, 1 }
   0x6   : > { %241 = sbr.rel (%p238_p2) target bundleno = 350 (0x15e), region = 48 }
   0xb   : > { %v1156_v0 = vld [vmem:[%s1442_s1 + $0x78] sm:$0xff]  ;;  %v1210_v3 = vmov 0.0   ;;  %v1155_v4 = vld [vmem:[%s1442_s1 + $0x70] sm:$0xff]  ;;  %s1450_s25 = smov (!%p269_p3, %s872_s25), 1  ;;  %v1154_v7 = vld [vmem:[%s1442_s1 + $0x68] sm:$0xff] }
   0xc   : > { %v1148_v1 = vld [vmem:[%s1442_s1 + $0x38] sm:$0xff]  ;;  %281 = vst [vmem:[#allocation2] sm:$0xff] %v1210_v3  ;;  %373 = vmatpush.bf16.msra.mxu0 %v1156_v0  ;;  %v1147_v5 = vld [vmem:[%s1442_s1 + $0x30] sm:$0xff]  ;;  %s1139_s15 = sshll.u32 %s1450_s25, 4  ;;  %v1146_v8 = vld [vmem:[%s1442_s1 + $0x28] sm:$0xff] }
   0xd   : > { %v1164_v2 = vld [vmem:[%s1442_s1 + $0xb8] sm:$0xff]  ;;  %435 = vmatpush.bf16.msra.mxu1 %v1148_v1  ;;  %282 = vst [vmem:[#allocation2 + $0x8] sm:$0xff] %v1210_v3  ;;  %v1163_v6 = vld [vmem:[%s1442_s1 + $0xb0] sm:$0xff]  ;;  %s273_s18 = scalar_lea.vmem %s1441_s0, %s1139_s15  ;;  %v1162_v9 = vld [vmem:[%s1442_s1 + $0xa8] sm:$0xff]  ;;  %s278_s12 = scalar_lea.vmem %s1448_s7, %s1139_s15 }
   0xe   : > { %517 = vmatpush.bf16.msra.mxu2 %v1164_v2  ;;  %283 = vst [vmem:[#allocation2 + $0x10] sm:$0x3] %v1210_v3  ;;  %v1294_v10 = vld [vmem:[%s273_s18] sm:$0xff]  ;;  %v1296_v11 = vld [vmem:[%s273_s18 + $0x8] sm:$0xff]  ;;  %v1152_v15 = vld [vmem:[%s1442_s1 + $0x58] sm:$0xff] }
   0xf   : > { %547 = vst [vmem:[#allocation3] sm:$0xff] %v1210_v3  ;;  %v1153_v12 = vld [vmem:[%s1442_s1 + $0x60] sm:$0xff]  ;;  %v1144_v16 = vld [vmem:[%s1442_s1 + $0x18] sm:$0xff]  ;;  %v1151_v18 = vld [vmem:[%s1442_s1 + $0x50] sm:$0xff]  ;;  %v307_v31 = vpack.c.bf16 %v1296_v11, %v1294_v10 }
  0x10   : > { %548 = vst [vmem:[#allocation3 + $0x8] sm:$0xff] %v1210_v3  ;;  %374 = vmatpush.bf16.msra.mxu0 %v1155_v4  ;;  %v1145_v13 = vld [vmem:[%s1442_s1 + $0x20] sm:$0xff]  ;;  %v1160_v17 = vld [vmem:[%s1442_s1 + $0x98] sm:$0xff]  ;;  %v1143_v19 = vld [vmem:[%s1442_s1 + $0x10] sm:$0xff] }
  0x11   : > { %436 = vmatpush.bf16.msra.mxu1 %v1147_v5  ;;  %549 = vst [vmem:[#allocation3 + $0x10] sm:$0x3] %v1210_v3  ;;  %v1161_v14 = vld [vmem:[%s1442_s1 + $0xa0] sm:$0xff]  ;;  %v1159_v20 = vld [vmem:[%s1442_s1 + $0x90] sm:$0xff]  ;;  %v1150_v21 = vld [vmem:[%s1442_s1 + $0x48] sm:$0xff] }
  0x12   : > { %518 = vmatpush.bf16.msra.mxu2 %v1163_v6  ;;  %284 = vst [vmem:[#allocation2 + $0x1] sm:$0xff] %v1294_v10  ;;  %v1142_v22 = vld [vmem:[%s1442_s1 + $0x8] sm:$0xff]  ;;  %v1149_v24 = vld [vmem:[%s1442_s1 + $0x40] sm:$0xff]  ;;  %v1180_v34 = vld [vmem:[%s1443_s2 + $0x78] sm:$0xff] }
  0x13   : > { %285 = vst [vmem:[#allocation2 + $0x9] sm:$0xff] %v1296_v11  ;;  %v1158_v23 = vld [vmem:[%s1442_s1 + $0x88] sm:$0xff]  ;;  %v1141_v25 = vld [vmem:[%s1442_s1] sm:$0xff]  ;;  %639 = vmatpush.bf16.msra.mxu3 %v1180_v34  ;;  %v1179_v35 = vld [vmem:[%s1443_s2 + $0x70] sm:$0xff] }
  0x14   : > { %375 = vmatpush.bf16.msra.mxu0 %v1154_v7  ;;  %v1157_v28 = vld [vmem:[%s1442_s1 + $0x80] sm:$0xff]  ;;  %v1172_v36 = vld [vmem:[%s1443_s2 + $0x38] sm:$0xff]  ;;  %v1178_v38 = vld [vmem:[%s1443_s2 + $0x68] sm:$0xff] }
  0x15   : > { %437 = vmatpush.bf16.msra.mxu1 %v1146_v8  ;;  %v1188_v37 = vld [vmem:[%s1443_s2 + $0xb8] sm:$0xff]  ;;  %v1171_v39 = vld [vmem:[%s1443_s2 + $0x30] sm:$0xff]  ;;  %v1177_v41 = vld [vmem:[%s1443_s2 + $0x60] sm:$0xff] }
  0x16   : > { %519 = vmatpush.bf16.msra.mxu2 %v1162_v9  ;;  %v1187_v40 = vld [vmem:[%s1443_s2 + $0xb0] sm:$0xff]  ;;  %v1170_v42 = vld [vmem:[%s1443_s2 + $0x28] sm:$0xff]  ;;  %v1176_v44 = vld [vmem:[%s1443_s2 + $0x58] sm:$0xff] }
  0x17   : > { %640 = vmatpush.bf16.msra.mxu3 %v1179_v35  ;;  %v1186_v43 = vld [vmem:[%s1443_s2 + $0xa8] sm:$0xff]  ;;  %v1169_v45 = vld [vmem:[%s1443_s2 + $0x20] sm:$0xff]  ;;  %v1175_v47 = vld [vmem:[%s1443_s2 + $0x50] sm:$0xff] }
  0x18   : > { %376 = vmatpush.bf16.msra.mxu0 %v1153_v12  ;;  %v1185_v46 = vld [vmem:[%s1443_s2 + $0xa0] sm:$0xff]  ;;  %v1168_v48 = vld [vmem:[%s1443_s2 + $0x18] sm:$0xff]  ;;  %v1174_v50 = vld [vmem:[%s1443_s2 + $0x48] sm:$0xff] }
  0x19   : > { %438 = vmatpush.bf16.msra.mxu1 %v1145_v13  ;;  %v286_v26 = vld [vmem:[#allocation2] sm:$0xff]  ;;  %v1184_v49 = vld [vmem:[%s1443_s2 + $0x98] sm:$0xff]  ;;  %v1167_v51 = vld [vmem:[%s1443_s2 + $0x10] sm:$0xff] }
  0x1a   : > { %520 = vmatpush.bf16.msra.mxu2 %v1161_v14  ;;  %v287_v27 = vld [vmem:[#allocation2 + $0x8] sm:$0xff]  ;;  %v1183_v52 = vld [vmem:[%s1443_s2 + $0x90] sm:$0xff]  ;;  %v1173_v53 = vld [vmem:[%s1443_s2 + $0x40] sm:$0xff] }
  0x1b   : > { %v449_v29 = vld [vmem:[#allocation2 + $0x2] sm:$0xff]  ;;  %v450_v30 = vld [vmem:[#allocation2 + $0xa] sm:$0xff]  ;;  %v288_v32 = vpack.c.bf16 %v287_v27, %v286_v26  ;;  %641 = vmatpush.bf16.msra.mxu3 %v1178_v38  ;;  %v1198_v61 = vld [vmem:[%s1444_s3] ss:$0 sm:$0xff] }
  0x1c   : > { %377 = vmatpush.bf16.msra.mxu0 %v1152_v15  ;;  %v451_v33 = vpack.c.bf16 %v450_v30, %v449_v29  ;;  %v1166_v54 = vld [vmem:[%s1443_s2 + $0x8] sm:$0xff]  ;;  %v1165_v56 = vld [vmem:[%s1443_s2] sm:$0xff] }
  0x1d   : > { %439 = vmatpush.bf16.msra.mxu1 %v1144_v16  ;;  %v1182_v55 = vld [vmem:[%s1443_s2 + $0x88] sm:$0xff]  ;;  %v1181_v57 = vld [vmem:[%s1443_s2 + $0x80] sm:$0xff] }
  0x1e   : > { %521 = vmatpush.bf16.msra.mxu2 %v1160_v17  ;;  %v1199_v0 = vld [vmem:[%s1445_s4] ss:$0 sm:$0xff] }
  0x1f   : > { %642 = vmatpush.bf16.msra.mxu3 %v1177_v41  ;;  %v1201_v27 = vld [vmem:[%s1447_s6] ss:$0 sm:$0xff] }
  0x20   : > { %378 = vmatpush.bf16.msra.mxu0 %v1151_v18 }
  0x21   : > { %440 = vmatpush.bf16.msra.mxu1 %v1143_v19 }
  0x22   : > { %522 = vmatpush.bf16.msra.mxu2 %v1159_v20 }
  0x23   : > { %643 = vmatpush.bf16.msra.mxu3 %v1176_v44 }
  0x24   : > { %379 = vmatpush.bf16.msra.mxu0 %v1150_v21 }
  0x25   : > { %441 = vmatpush.bf16.msra.mxu1 %v1142_v22 }
  0x26   : > { %523 = vmatpush.bf16.msra.mxu2 %v1158_v23 }
  0x27   : > { %644 = vmatpush.bf16.msra.mxu3 %v1175_v47 }
  0x28   : > { %380 = vmatpush.bf16.msra.mxu0 %v1149_v24 }
  0x29   : > { %442 = vmatpush.bf16.msra.mxu1 %v1141_v25  ;;  %v1200_v25 = vld [vmem:[%s1446_s5] ss:$0 sm:$0xff] }
  0x2a   : > { %524 = vmatpush.bf16.msra.mxu2 %v1157_v28 }
  0x2b   : > { %381 = vmatmul.bf16.vlgmr.msra.gmra.mxu0 %v307_v31  ;;  %645 = vmatpush.bf16.msra.mxu3 %v1174_v50 }
  0x2c   : > { %443 = vmatmul.bf16.vlgmr.msra.gmra.mxu1 %v288_v32  ;;  %701 = vmatpush.bf16.msrb.mxu0 %v1172_v36 }
  0x2d   : > { %525 = vmatmul.bf16.vlgmr.msra.gmra.mxu2 %v451_v33  ;;  %783 = vmatpush.bf16.msrb.mxu1 %v1188_v37 }
  0x2f   : > { %646 = vmatpush.bf16.msra.mxu3 %v1173_v53 }
  0x30   : > { %702 = vmatpush.bf16.msrb.mxu0 %v1171_v39 }
  0x31   : > { %784 = vmatpush.bf16.msrb.mxu1 %v1187_v40 }
  0x34   : > { %703 = vmatpush.bf16.msrb.mxu0 %v1170_v42 }
  0x35   : > { %785 = vmatpush.bf16.msrb.mxu1 %v1186_v43 }
  0x38   : > { %704 = vmatpush.bf16.msrb.mxu0 %v1169_v45 }
  0x39   : > { %786 = vmatpush.bf16.msrb.mxu1 %v1185_v46 }
  0x3c   : > { %705 = vmatpush.bf16.msrb.mxu0 %v1168_v48 }
  0x3d   : > { %787 = vmatpush.bf16.msrb.mxu1 %v1184_v49 }
  0x40   : > { %706 = vmatpush.bf16.msrb.mxu0 %v1167_v51 }
  0x41   : > { %788 = vmatpush.bf16.msrb.mxu1 %v1183_v52 }
  0x44   : > { %707 = vmatpush.bf16.msrb.mxu0 %v1166_v54 }
  0x45   : > { %789 = vmatpush.bf16.msrb.mxu1 %v1182_v55 }
  0x48   : > { %708 = vmatpush.bf16.msrb.mxu0 %v1165_v56 }
  0x49   : > { %790 = vmatpush.bf16.msrb.mxu1 %v1181_v57 }
  0xa8   : > { %v382_v58 = vpop.f32.mrf.mxu0 }
  0xa9   : > { %v444_v59 = vpop.f32.mrf.mxu1 }
  0xaa   : > { %v445_v60 = vadd.f32 %v444_v59, %v382_v58 }
  0xb0   : > { %v526_v62 = vpop.f32.mrf.mxu2  ;;  %v384_v2 = vpop.f32.mrf.mxu0 }
  0xb1   : > { %v531_v63 = vadd.f32 %v526_v62, %v445_v60  ;;  %v446_v3 = vpop.f32.mrf.mxu1 }
  0xb2   : > { %v447_v6 = vadd.f32 %v446_v3, %v384_v2 }
  0xb3   : > { %v537_v1 = vmul.f32 %v1198_v61, %v531_v63 }
  0xb5   : > { %v543_v4 = vadd.f32 %v1199_v0, %v537_v1 }
  0xb7   : > { %v545_v5 = vmax.f32 %v543_v4, 0.0 }
  0xb8   : > { %v528_v7 = vpop.f32.mrf.mxu2 }
  0xb9   : > { %550 = vst [vmem:[#allocation3 + $0x1] sm:$0xff] %v545_v5  ;;  %v532_v8 = vadd.f32 %v528_v7, %v447_v6 }
  0xbb   : > { %v538_v9 = vmul.f32 %v1198_v61, %v532_v8 }
  0xbd   : > { %v544_v12 = vadd.f32 %v1199_v0, %v538_v9 }
  0xbf   : > { %v546_v13 = vmax.f32 %v544_v12, 0.0 }
  0xc0   : > { %v552_v15 = vld [vmem:[#allocation3] sm:$0xff] }
  0xc1   : > { %551 = vst [vmem:[#allocation3 + $0x9] sm:$0xff] %v546_v13  ;;  %v573_v14 = vpack.c.bf16 %v546_v13, %v545_v5 }
  0xc3   : > { %647 = vmatmul.bf16.vlgmr.msra.gmra.mxu3 %v573_v14 }
  0xc8   : > { %v553_v16 = vld [vmem:[#allocation3 + $0x8] sm:$0xff] }
  0xc9   : > { %v715_v17 = vld [vmem:[#allocation3 + $0x2] sm:$0xff]  ;;  %v716_v18 = vld [vmem:[#allocation3 + $0xa] sm:$0xff]  ;;  %v554_v19 = vpack.c.bf16 %v553_v16, %v552_v15 }
  0xca   : > { %v717_v20 = vpack.c.bf16 %v716_v18, %v715_v17 }
  0xcb   : > { %709 = vmatmul.bf16.vlgmr.msrb.gmra.mxu0 %v554_v19 }
  0xcc   : > { %791 = vmatmul.bf16.vlgmr.msrb.gmra.mxu1 %v717_v20 }
 0x146   : > { %v648_v21 = vpop.f32.mrf.mxu3 }
 0x148   : > { %v710_v22 = vpop.f32.mrf.mxu0 }
 0x149   : > { %v792_v23 = vpop.f32.mrf.mxu1  ;;  %v711_v24 = vadd.f32 %v710_v22, %v648_v21 }
 0x14b   : > { %v797_v26 = vadd.f32 %v792_v23, %v711_v24 }
 0x14d   : > { %v803_v28 = vmul.f32 %v1200_v25, %v797_v26 }
 0x14e   : > { %v650_v31 = vpop.f32.mrf.mxu3 }
 0x14f   : > { %v809_v29 = vadd.f32 %v1201_v27, %v803_v28 }
 0x150   : > { %v712_v30 = vpop.f32.mrf.mxu0 }
 0x151   : > { %v811_v32 = vadd.f32 %v809_v29, %v1294_v10  ;;  %v713_v33 = vadd.f32 %v712_v30, %v650_v31  ;;  %v794_v34 = vpop.f32.mrf.mxu1 }
 0x153   : > { %v813_v35 = vmax.f32 %v811_v32, 0.0  ;;  %v798_v36 = vadd.f32 %v794_v34, %v713_v33 }
 0x155   : > { %815 = vst [vmem:[%s278_s12] sm:$0xff] %v813_v35  ;;  %v804_v37 = vmul.f32 %v1200_v25, %v798_v36 }
 0x157   : > { %v810_v38 = vadd.f32 %v1201_v27, %v804_v37 }
 0x159   : > { %v812_v39 = vadd.f32 %v810_v38, %v1296_v11 }
 0x15b   : > { %v814_v40 = vmax.f32 %v812_v39, 0.0 }
 0x15d   : > { %816 = vst [vmem:[%s278_s12 + $0x8] sm:$0xff] %v814_v40 }
 0x15e PF: > { %s17_s24 = sadd.s32 1, %s1208_s24  }
 0x15f   : > { %p14_p4 = scmp.ge.s32.totalorder %s17_s24, 4  }
 0x161   :  { %16 = sbr.rel (!%p14_p4) target bundleno = 1 (0x1), region = 82 }

</bundles_post_ra>
